<compile_context>
chip_gen: v5e
topology: v5e:2x2
jax: 0.10.0
libtpu: 0.0.40
codegen_flags: <defaults>
</compile_context>

<pallas_src>
import functools

import jax
import jax.numpy as jnp
from jax.experimental import pallas as pl
from jax.experimental.pallas import tpu as pltpu

EPS = 1e-5
SUBLANES_BF16 = 16  # C_out padding multiple (bf16 sublane tile)


def _conv_tile(x_ref, w_ref, *, k, d, c_in, th_out, w_out):
    """One conv tile as a single MXU matmul.

    x_ref: (1, C_in, th_in, W_pad) bf16  (th_in = th_out + d*(k-1))
    w_ref: (C_out_pad, k*k*C_in)   bf16
    Returns (C_out_pad, th_out*w_out) f32.
    """
    xi = x_ref[0]                                        # (C_in, th_in, W_pad)
    m = th_out * w_out
    taps = []
    for kh in range(k):
        for kw in range(k):
            t = xi[:, kh * d:kh * d + th_out, kw * d:kw * d + w_out]
            taps.append(t.reshape(c_in, m))              # (C_in, M)
    patches = jnp.concatenate(taps, axis=0)              # (k*k*C_in, M)
    return jnp.dot(w_ref[...], patches,
                   preferred_element_type=jnp.float32)   # (C_out_pad, M)


def _stats_kernel(x_ref, w_ref, stats_ref, *, k, d, c_in, th_out, w_out):
    """Pass 1: per-output-channel sum (col 0) and sum-of-squares (col 1)."""
    @pl.when((pl.program_id(0) == 0) & (pl.program_id(1) == 0))
    def _():
        stats_ref[...] = jnp.zeros_like(stats_ref)

    conv = _conv_tile(x_ref, w_ref, k=k, d=d, c_in=c_in,
                      th_out=th_out, w_out=w_out)
    # Two direct column accumulations (no concat -> no per-step relayout).
    stats_ref[:, 0:1] += jnp.sum(conv, axis=1, keepdims=True)
    stats_ref[:, 1:2] += jnp.sum(conv * conv, axis=1, keepdims=True)


def _bn_relu_kernel(x_ref, w_ref, params_ref, o_ref, *, k, d, c_in, th_out, w_out):
    """Pass 2: recompute conv tile, y = conv*scale + shift, ReLU, cast, store."""
    conv = _conv_tile(x_ref, w_ref, k=k, d=d, c_in=c_in,
                      th_out=th_out, w_out=w_out)
    scale = params_ref[:, 0:1]                           # (C_out_pad, 1)
    shift = params_ref[:, 1:2]
    y = jnp.maximum(conv * scale + shift, 0.0)
    o_ref[0] = y.astype(o_ref.dtype)                     # lane-dense bf16 store


def _pick_tile_rows(h_out, w_out, max_tile_m=2048):
    """Largest divisor of h_out whose tile has <= max_tile_m spatial positions."""
    best = 1
    for th in range(1, h_out + 1):
        if h_out % th == 0 and th * w_out <= max_tile_m:
            best = th
    return best


def conv_bn_relu(x, weight, bias, gamma, beta, *, padding, dilation=1,
                 tile_rows=None, out_dtype=jnp.bfloat16):
    """x: [N, C_in, H, W] (NCHW). Returns [N, C_out, H_out, W_out] (NCHW)."""
    N, C_in, H, W = x.shape
    C_out, C_in_w, kH, kW = weight.shape
    assert kH == kW and C_in_w == C_in, "square, matching-channel kernels only"
    k, d = kH, dilation
    h_out = H + 2 * padding - d * (k - 1)
    w_out = W + 2 * padding - d * (k - 1)
    w_pad = W + 2 * padding
    m_img = h_out * w_out
    count = float(N * m_img)

    # Conv bias is mathematically dead under training-mode BN (batch mean
    # removes it), so it is never fed to the kernels.
    del bias

    th_out = _pick_tile_rows(h_out, w_out) if tile_rows is None else tile_rows
    assert h_out % th_out == 0, "tile_rows must divide the output height"
    # TODO(synk): mask partial row tiles so arbitrary tile_rows are supported.
    T = h_out // th_out
    th_in = th_out + d * (k - 1)
    tile_m = th_out * w_out
    kc = k * k * C_in
    c_out_pad = ((C_out + SUBLANES_BF16 - 1) // SUBLANES_BF16) * SUBLANES_BF16

    # ---- layout prep (bf16 MXU inputs) --------------------------------------
    x_p = jnp.pad(x, ((0, 0), (0, 0), (padding, padding), (padding, padding)))
    x_p = x_p.astype(jnp.bfloat16)                        # (N, C_in, h_pad, w_pad)
    # Overlapping row tiles (halo of d*(k-1) rows) so BlockSpecs stay simple.
    # TODO(synk): replace with in-kernel halo DMA (memory_space=pl.ANY +
    # pltpu.make_async_copy) to avoid this wrapper-side materialization of x.
    x_tiles = jnp.stack(
        [x_p[:, :, t * th_out:t * th_out + th_in, :] for t in range(T)], axis=1)
    x_tiles = x_tiles.reshape(N * T, C_in, th_in, w_pad)

    # weight (C_out, C_in, k, k) -> (C_out_pad, k*k*C_in); row order (kh, kw, c)
    # matches the tap concatenation order inside the kernel.
    w_mat = jnp.transpose(weight, (0, 2, 3, 1)).reshape(C_out, kc)
    w_mat = jnp.zeros((c_out_pad, kc), jnp.float32).at[:C_out, :].set(w_mat)
    w_mat = w_mat.astype(jnp.bfloat16)

    x_spec = pl.BlockSpec((1, C_in, th_in, w_pad),
                          lambda n, t: (n * T + t, 0, 0, 0))
    w_spec = pl.BlockSpec((c_out_pad, kc), lambda n, t: (0, 0))
    vec_spec = pl.BlockSpec((c_out_pad, 2), lambda n, t: (0, 0))
    kern_kwargs = dict(k=k, d=d, c_in=C_in, th_out=th_out, w_out=w_out)

    # ---- pass 1: per-channel sum / sumsq over the whole batch ----------------
    stats = pl.pallas_call(
        functools.partial(_stats_kernel, **kern_kwargs),
        out_shape=jax.ShapeDtypeStruct((c_out_pad, 2), jnp.float32),
        grid=(N, T),
        in_specs=[x_spec, w_spec],
        out_specs=vec_spec,
        compiler_params=pltpu.CompilerParams(
            dimension_semantics=("arbitrary", "arbitrary")),  # resident stats acc
    )(x_tiles, w_mat)
    # TODO(synk): on v7x split pass-1 into per-TensorCore partial accumulators
    # (leading grid axis of 2) so pass 1 can also use both cores.
    # TODO(synk): on v5e/v6e the two passes could be fused into one pallas_call
    # with a leading phase axis; kept split so pass 2 can run 2-TC on v7x.

    # ---- fold BN into one scale/shift (computed once, outside the grid) ------
    gamma_p = jnp.zeros((c_out_pad,), jnp.float32).at[:C_out].set(
        gamma.astype(jnp.float32))
    beta_p = jnp.zeros((c_out_pad,), jnp.float32).at[:C_out].set(
        beta.astype(jnp.float32))
    mean = stats[:, 0] / count
    # Single-pass variance (E[x^2] - E[x]^2); fine at these scales.
    var = jnp.maximum(stats[:, 1] / count - mean * mean, 0.0)  # biased batch var
    scale = gamma_p * jax.lax.rsqrt(var + EPS)
    shift = beta_p - mean * scale
    params = jnp.stack([scale, shift], axis=1)                 # (C_out_pad, 2)

    # ---- pass 2: conv tile, y = conv*scale + shift, ReLU, bf16 store ---------
    out_flat = pl.pallas_call(
        functools.partial(_bn_relu_kernel, **kern_kwargs),
        out_shape=jax.ShapeDtypeStruct((N, c_out_pad, m_img), out_dtype),
        grid=(N, T),
        in_specs=[x_spec, w_spec, vec_spec],
        out_specs=pl.BlockSpec((1, c_out_pad, tile_m), lambda n, t: (n, 0, t)),
        compiler_params=pltpu.CompilerParams(
            dimension_semantics=("parallel", "parallel")),     # both TCs on v7x
    )(x_tiles, w_mat, params)

    # (N, C_out_pad, h_out*w_out) -> NCHW via a cheap channel slice + reshape
    # (no transpose needed).
    return out_flat[:, :C_out, :].reshape(N, C_out, h_out, w_out)


def _reference(x, weight, bias, gamma, beta, *, padding, dilation=1):
    """Pure-JAX reference: conv (NCHW) + training-mode BN + ReLU (all f32)."""
    conv = jax.lax.conv_general_dilated(
        x, weight,
        window_strides=(1, 1),
        padding=[(padding, padding), (padding, padding)],
        rhs_dilation=(dilation, dilation),
        dimension_numbers=("NCHW", "OIHW", "NCHW"),
        precision=jax.lax.Precision.HIGHEST,
    ) + bias[None, :, None, None]
    mean = jnp.mean(conv, axis=(0, 2, 3), keepdims=True)
    var = jnp.mean((conv - mean) ** 2, axis=(0, 2, 3), keepdims=True)
    xn = (conv - mean) * jax.lax.rsqrt(var + EPS)
    y = gamma[None, :, None, None] * xn + beta[None, :, None, None]
    return jnp.maximum(y, 0.0)


if __name__ == "__main__":
    # ConvBn2d_D(in_channels=4, out_channels=8, kernel_size=3, padding=1)
    N, C_in, H, W = 2, 4, 16, 16
    C_out, k, padding, dilation = 8, 3, 1, 1

    key = jax.random.PRNGKey(0)
    kx, kw, kb = jax.random.split(key, 3)
    x = jax.random.normal(kx, (N, C_in, H, W), dtype=jnp.float32)
    weight = 0.1 * jax.random.normal(kw, (C_out, C_in, k, k), dtype=jnp.float32)
    bias = 0.1 * jax.random.normal(kb, (C_out,), dtype=jnp.float32)
    # BatchNorm2d default init: weight (gamma) = 1, bias (beta) = 0
    gamma = jnp.ones((C_out,), dtype=jnp.float32)
    beta = jnp.zeros((C_out,), dtype=jnp.float32)

    # tile_rows=8 -> 2 spatial tiles per image (tile_m = 128, lane-dense),
    # grid = (2, 2): exercises the spatial-tiling / pipelining path.
    out = conv_bn_relu(x, weight, bias, gamma, beta,
                       padding=padding, dilation=dilation, tile_rows=8)
    out = jax.block_until_ready(out)

    # Reference computed on bf16-rounded conv inputs (the kernel feeds the MXU
    # bf16).  The kernel output is bf16 (per perf review), so the tolerance is
    # set by bf16 output rounding; stats/affine/ReLU are f32 in both.  The
    # reference keeps the conv bias -> also checks the bias-cancellation under
    # training-mode BN is exact.
    x_r = x.astype(jnp.bfloat16).astype(jnp.float32)
    w_r = weight.astype(jnp.bfloat16).astype(jnp.float32)
    ref = _reference(x_r, w_r, bias, gamma, beta,
                     padding=padding, dilation=dilation)

    out_f32 = out.astype(jnp.float32)
    assert out.shape == (N, C_out, H, W)
    assert out.dtype == jnp.bfloat16
    assert jnp.allclose(out_f32, ref, atol=2e-2, rtol=2e-2), \
        float(jnp.max(jnp.abs(out_f32 - ref)))

    print("KERNEL_OK")
</pallas_src>

<mosaic_0001>
module attributes {stable_mosaic.version = 11 : i64} {
  func.func @_stats_kernel(%arg0: i32, %arg1: i32, %arg2: memref<1x4x10x18xbf16, #tpu.memory_space<vmem>>, %arg3: memref<16x36xbf16, #tpu.memory_space<vmem>>, %arg4: memref<16x2xf32, #tpu.memory_space<vmem>>) attributes {dimension_semantics = [#tpu.dimension_semantics<arbitrary>, #tpu.dimension_semantics<arbitrary>], iteration_bounds = array<i64: 2, 2>, scalar_prefetch = 0 : i64, scratch_operands = 0 : i64, tpu.core_type = #tpu.core_type<tc>, window_params = [{transform_indices = @transform_0, window_bounds = array<i64: 1, 4, 10, 18>}, {pipeline_mode = #tpu.pipeline_mode<synchronous>, transform_indices = @transform_1, window_bounds = array<i64: 16, 36>}, {pipeline_mode = #tpu.pipeline_mode<synchronous>, transform_indices = @transform_2, window_bounds = array<i64: 16, 2>}]} {
    %c0_i32 = arith.constant 0 : i32
    %0 = arith.cmpi eq, %arg0, %c0_i32 : i32
    %c0_i32_0 = arith.constant 0 : i32
    %1 = arith.cmpi eq, %arg1, %c0_i32_0 : i32
    %2 = arith.andi %0, %1 : i1
    %3 = arith.extui %2 : i1 to i32
    %c0_i32_1 = arith.constant 0 : i32
    %4 = arith.cmpi ne, %3, %c0_i32_1 : i32
    scf.if %4 {
      %cst_16 = arith.constant 0.000000e+00 : f32
      %39 = vector.broadcast %cst_16 : f32 to vector<16x2xf32>
      %c0_17 = arith.constant 0 : index
      %c0_18 = arith.constant 0 : index
      %40 = vector.load %arg4[%c0_17, %c0_18] : memref<16x2xf32, #tpu.memory_space<vmem>>, vector<16x2xf32>
      tpu.vector_store %arg4[%c0_17, %c0_18], %39 {strides = array<i32>} : memref<16x2xf32, #tpu.memory_space<vmem>>, vector<16x2xf32>,
    } else {
    }
    %c0 = arith.constant 0 : index
    %c0_2 = arith.constant 0 : index
    %c0_3 = arith.constant 0 : index
    %c0_4 = arith.constant 0 : index
    %5 = vector.load %arg2[%c0, %c0_2, %c0_3, %c0_4] : memref<1x4x10x18xbf16, #tpu.memory_space<vmem>>, vector<1x4x10x18xbf16>
    %6 = vector.shape_cast %5 : vector<1x4x10x18xbf16> to vector<4x10x18xbf16>
    %7 = vector.extract_strided_slice %6 {offsets = [0, 0, 0], sizes = [4, 8, 16], strides = [1, 1, 1]} : vector<4x10x18xbf16> to vector<4x8x16xbf16>
    %8 = vector.shape_cast %7 : vector<4x8x16xbf16> to vector<4x128xbf16>
    %9 = vector.extract_strided_slice %6 {offsets = [0, 0, 1], sizes = [4, 8, 16], strides = [1, 1, 1]} : vector<4x10x18xbf16> to vector<4x8x16xbf16>
    %10 = vector.shape_cast %9 : vector<4x8x16xbf16> to vector<4x128xbf16>
    %11 = vector.extract_strided_slice %6 {offsets = [0, 0, 2], sizes = [4, 8, 16], strides = [1, 1, 1]} : vector<4x10x18xbf16> to vector<4x8x16xbf16>
    %12 = vector.shape_cast %11 : vector<4x8x16xbf16> to vector<4x128xbf16>
    %13 = vector.extract_strided_slice %6 {offsets = [0, 1, 0], sizes = [4, 8, 16], strides = [1, 1, 1]} : vector<4x10x18xbf16> to vector<4x8x16xbf16>
    %14 = vector.shape_cast %13 : vector<4x8x16xbf16> to vector<4x128xbf16>
    %15 = vector.extract_strided_slice %6 {offsets = [0, 1, 1], sizes = [4, 8, 16], strides = [1, 1, 1]} : vector<4x10x18xbf16> to vector<4x8x16xbf16>
    %16 = vector.shape_cast %15 : vector<4x8x16xbf16> to vector<4x128xbf16>
    %17 = vector.extract_strided_slice %6 {offsets = [0, 1, 2], sizes = [4, 8, 16], strides = [1, 1, 1]} : vector<4x10x18xbf16> to vector<4x8x16xbf16>
    %18 = vector.shape_cast %17 : vector<4x8x16xbf16> to vector<4x128xbf16>
    %19 = vector.extract_strided_slice %6 {offsets = [0, 2, 0], sizes = [4, 8, 16], strides = [1, 1, 1]} : vector<4x10x18xbf16> to vector<4x8x16xbf16>
    %20 = vector.shape_cast %19 : vector<4x8x16xbf16> to vector<4x128xbf16>
    %21 = vector.extract_strided_slice %6 {offsets = [0, 2, 1], sizes = [4, 8, 16], strides = [1, 1, 1]} : vector<4x10x18xbf16> to vector<4x8x16xbf16>
    %22 = vector.shape_cast %21 : vector<4x8x16xbf16> to vector<4x128xbf16>
    %23 = vector.extract_strided_slice %6 {offsets = [0, 2, 2], sizes = [4, 8, 16], strides = [1, 1, 1]} : vector<4x10x18xbf16> to vector<4x8x16xbf16>
    %24 = vector.shape_cast %23 : vector<4x8x16xbf16> to vector<4x128xbf16>
    %25 = tpu.concatenate %8, %10, %12, %14, %16, %18, %20, %22, %24 in 0 : vector<4x128xbf16>, vector<4x128xbf16>, vector<4x128xbf16>, vector<4x128xbf16>, vector<4x128xbf16>, vector<4x128xbf16>, vector<4x128xbf16>, vector<4x128xbf16>, vector<4x128xbf16> -> vector<36x128xbf16>
    %c0_5 = arith.constant 0 : index
    %c0_6 = arith.constant 0 : index
    %26 = vector.load %arg3[%c0_5, %c0_6] : memref<16x36xbf16, #tpu.memory_space<vmem>>, vector<16x36xbf16>
    %cst = arith.constant dense<0.000000e+00> : vector<16x128xf32>
    %27 = tpu.matmul %26, %25, %cst {dimension_numbers = #tpu.dot_dimension_numbers<[1], [0], [0], [1], [0, 0, 1, 1], [], []>} : vector<16x36xbf16>, vector<36x128xbf16>, vector<16x128xf32> -> vector<16x128xf32>
    %c0_7 = arith.constant 0 : index
    %c0_8 = arith.constant 0 : index
    %28 = vector.load %arg4[%c0_7, %c0_8] : memref<16x2xf32, #tpu.memory_space<vmem>>, vector<16x1xf32>
    %cst_9 = arith.constant dense<0.000000e+00> : vector<16xf32>
    %29 = vector.multi_reduction <add>, %27, %cst_9 [1] : vector<16x128xf32> to vector<16xf32>
    %30 = vector.shape_cast %29 : vector<16xf32> to vector<16x1xf32>
    %31 = arith.addf %28, %30 : vector<16x1xf32>
    %c0_10 = arith.constant 0 : index
    %c0_11 = arith.constant 0 : index
    %32 = vector.load %arg4[%c0_10, %c0_11] : memref<16x2xf32, #tpu.memory_space<vmem>>, vector<16x1xf32>
    tpu.vector_store %arg4[%c0_10, %c0_11], %31 {strides = array<i32>} : memref<16x2xf32, #tpu.memory_space<vmem>>, vector<16x1xf32>,
    %c0_12 = arith.constant 0 : index
    %c1 = arith.constant 1 : index
    %33 = vector.load %arg4[%c0_12, %c1] : memref<16x2xf32, #tpu.memory_space<vmem>>, vector<16x1xf32>
    %34 = arith.mulf %27, %27 : vector<16x128xf32>
    %cst_13 = arith.constant dense<0.000000e+00> : vector<16xf32>
    %35 = vector.multi_reduction <add>, %34, %cst_13 [1] : vector<16x128xf32> to vector<16xf32>
    %36 = vector.shape_cast %35 : vector<16xf32> to vector<16x1xf32>
    %37 = arith.addf %33, %36 : vector<16x1xf32>
    %c0_14 = arith.constant 0 : index
    %c1_15 = arith.constant 1 : index
    %38 = vector.load %arg4[%c0_14, %c1_15] : memref<16x2xf32, #tpu.memory_space<vmem>>, vector<16x1xf32>
    tpu.vector_store %arg4[%c0_14, %c1_15], %37 {strides = array<i32>} : memref<16x2xf32, #tpu.memory_space<vmem>>, vector<16x1xf32>,
    return
  }
  func.func @transform_0(%arg0: i32, %arg1: i32) -> (i32, i32, i32, i32) {
    %c2_i32 = arith.constant 2 : i32
    %0 = arith.muli %arg0, %c2_i32 : i32
    %1 = arith.addi %0, %arg1 : i32
    %c0_i32 = arith.constant 0 : i32
    %c0_i32_0 = arith.constant 0 : i32
    %c0_i32_1 = arith.constant 0 : i32
    %c0_i32_2 = arith.constant 0 : i32
    return %1, %c0_i32, %c0_i32_0, %c0_i32_1 : i32, i32, i32, i32
  }
  func.func @transform_1(%arg0: i32, %arg1: i32) -> (i32, i32) {
    %c0_i32 = arith.constant 0 : i32
    %c0_i32_0 = arith.constant 0 : i32
    %c0_i32_1 = arith.constant 0 : i32
    return %c0_i32, %c0_i32_0 : i32, i32
  }
  func.func @transform_2(%arg0: i32, %arg1: i32) -> (i32, i32) {
    %c0_i32 = arith.constant 0 : i32
    %c0_i32_0 = arith.constant 0 : i32
    %c0_i32_1 = arith.constant 0 : i32
    return %c0_i32, %c0_i32_0 : i32, i32
  }
}

</mosaic_0001>

<bundles_post_ra>
// kernel: tpu_custom_call.1
= control target key start
LH: loop header
LB: loop body
LE: loop exit
PB: predicated region body
PF: predicated region fallthrough
CT: control target
= control target key end

     0   :  { %s1593_s9 = smov 0   ;;  %s1595_s10 = smov 0   ;;  %s2441_s0 = inlined_call_operand.vmem [shape: bf16[4,4,10,18], index: 0, kind: input, shape index: {}]   ;;  %s2442_s1 = inlined_call_operand.vmem [shape: bf16[16,36], index: 1, kind: input, shape index: {}]   ;;  %s2443_s2 = inlined_call_operand.vmem [shape: f32[16,2], index: 2, kind: output, shape index: {}]  }
   0x1   :  { %s1597_s11 = smov 0   ;;  %s1599_s12 = smov 0  }
   0x2   :  { %s1601_s13 = smov 0  }
   0x3 LB: > { %s21_s14 = sadd.s32 1, %s1556_s11  ;;  %s24_s15 = sadd.s32 1, %s1560_s12  ;;  %s1564_s13 = sphi %s1601_s13, %s12_s13   ;;  %s1560_s12 = sphi %s1599_s12, %s2460_s12   ;;  %s1556_s11 = sphi %s1597_s11, %s2459_s11   ;;  %s1552_s10 = sphi %s1595_s10, %s2458_s10   ;;  %s1548_s9 = sphi %s1593_s9, %s2457_s9  }
   0x4   : > { %p22_p0 = scmp.ge.s32.totalorder %s21_s14, 2  ;;  %p1457_p1 = scmp.ge.s32.totalorder %s1564_s13, 1 }
   0x5   : > { %p127_p2 = scmp.lt.s32.totalorder %s1564_s13, 5 }
   0x6   : > { %s2462_s14 = smov (%p22_p0, %s21_s14), 0  ;;  %s2464_s15 = smov (!%p22_p0, %s24_s15), %s1560_s12 }
   0x7   : > { %p128_p3 = pnand %p1457_p1, %p127_p2  ;;  %p26_p4 = scmp.ge.s32.totalorder %s2464_s15, 2 }
   0x9   : > { %s2466_s15 = smov (%p26_p4, %s2464_s15), 0  ;;  %131 = sbr.rel (%p128_p3) target bundleno = 743 (0x2e7), region = 28 }
   0xe   : > { %s1458_s16 = sshll.u32 %s1552_s10, 1  ;;  %p156_p5 = scmp.eq.s32.totalorder %s1552_s10, 0 }
   0xf   : > { %s147_s17 = sadd.s32 %s1548_s9, %s1458_s16  ;;  %p157_p6 = scmp.eq.s32.totalorder %s1548_s9, 0 }
  0x10   : > { %p148_p7 = scmp.lt.s32.totalorder %s147_s17, 3 }
  0x11   : > { %p158_p8 = pnand %p157_p6, %p156_p5 }
  0x12   : > { %s2468_s17 = smov (!%p148_p7, %s147_s17), 3 }
  0x13   : > { %s1472_s18 = sshll.u32 %s2468_s17, 5  ;;  %161 = sbr.rel (%p158_p8) target bundleno = 27 (0x1b), region = 32 }
  0x14   : > { %s1626_s21 = scalar_lea.vmem %s2441_s0, %s1472_s18 }
  0x18   : > { %vm162_vm0 = vcmask 15360   ;;  %v1566_v0 = vmov 0.0  }
  0x19   : > { %163 = vst.msk [vmem:[%s2443_s2] sm:$0xff] %vm162_vm0, %v1566_v0 }
  0x1a   : > { %164 = vst.msk [vmem:[%s2443_s2 + $0x8] sm:$0xff] %vm162_vm0, %v1566_v0 }
  0x1b PF: > { %v1635_v1 = vld [vmem:[%s1626_s21 + $0x10] sm:$0xf]  ;;  %v170_v2 = vld [vmem:[%s1626_s21 + $0x14] sm:$0x1]  ;;  %vm956_vm1 = vcmask 1042432   ;;  %vm957_vm2 = vcmask 1046532  }
  0x1c   : > { %v1463_v3 = vrot.slane %v1635_v1, 9  ;;  %v969_v4 = vrot.slane %v170_v2, 5  ;;  %v182_v5 = vshrl.u32 %v1635_v1, 16  ;;  %v1641_v6 = vld [vmem:[%s1626_s21 + $0x18] sm:$0xf]  ;;  %vm1643_vm3 = vmor %vm956_vm1, %vm957_vm2  ;;  %v572_v8 = vshll.u32 %v1635_v1, 16 }
  0x1d   : > { %v578_v9 = vshll.u32 %v170_v2, 16  ;;  %vm543_vm4 = vsmask.f32 3328  ;;  %v172_v12 = vld [vmem:[%s1626_s21 + $0x1c] sm:$0x1]  ;;  %v1464_v13 = vrot.slane %v1641_v6, 9 }
  0x1e   : > { %v1650_v10 = vsel %vm1643_vm3, %v1463_v3, %v969_v4  ;;  %v571_v11 = vrot.slane %v182_v5, 4  ;;  %s1567_s26 = smov 126   ;;  %vm544_vm5 = vsmask.f32 7440  ;;  %v574_v15 = vrot.slane %v572_v8, 5  ;;  %s1568_s27 = smov 127  }
  0x1f   : > { %1215 = vrot.lane.b32.xlu1 %v1650_v10, %s1567_s26  ;;  %v984_v14 = vshrl.u32 %v1650_v10, 16  ;;  %v1658_v16 = vld [vmem:[%s1626_s21 + $0x8] sm:$0xf]  ;;  %v973_v17 = vrot.slane %v172_v12, 5  ;;  %v183_v18 = vshrl.u32 %v1641_v6, 16  ;;  %v584_v19 = vshll.u32 %v1641_v6, 16  ;;  %vm1666_vm6 = vmor %vm543_vm4, %vm544_vm5 }
  0x20   : > { %v590_v20 = vshll.u32 %v172_v12, 16  ;;  %v575_v21 = vor.u32 %v574_v15, %v571_v11  ;;  %v580_v22 = vrot.slane %v578_v9, 5  ;;  %v168_v23 = vld [vmem:[%s1626_s21 + $0xc] sm:$0x1]  ;;  %v177_v24 = vshrl.u32 %v1658_v16, 16  ;;  %s1571_s28 = smov 16  }
  0x21   : > { %v560_v25 = vshll.u32 %v1658_v16, 16  ;;  %v1672_v27 = vsel %vm1643_vm3, %v1464_v13, %v973_v17  ;;  %v583_v28 = vrot.slane %v183_v18, 4  ;;  %v586_v29 = vrot.slane %v584_v19, 5  ;;  %v1675_v31 = vld [vmem:[%s1626_s21] sm:$0xf]  ;;  %s1572_s29 = smov 32  }
  0x22   : > { %v592_v30 = vrot.slane %v590_v20, 5  ;;  %v576_v32 = vrot.slane %v575_v21, 4  ;;  %v985_v33 = vshrl.u32 %v1672_v27, 16  ;;  %v983_v34 = vpack.i.b16 %v1672_v27, %v1650_v10  ;;  %v166_v42 = vld [vmem:[%s1626_s21 + $0x4] sm:$0x1]  ;;  %s1573_s30 = smov 48  }
  0x23   : > { %v1680_v35 = vpack.i.b16 %v183_v18, %v182_v5  ;;  %v587_v36 = vor.u32 %v586_v29, %v583_v28  ;;  %v559_v37 = vrot.slane %v177_v24, 4  ;;  %v562_v38 = vrot.slane %v560_v25, 5  ;;  %s1574_s3 = smov 80   ;;  %s1575_s4 = smov 64  }
  0x24   : > { %v566_v39 = vshll.u32 %v168_v23, 16  ;;  %v1686_v40 = vsel %vm1666_vm6, %v576_v32, %v580_v22  ;;  %v1688_v41 = vpack.i.b16 %v985_v33, %v984_v14  ;;  %v176_v43 = vshrl.u32 %v1675_v31, 16  ;;  %s1576_s5 = smov 96   ;;  %s1577_s6 = smov 112  }
  0x25   : > { %834 = vrot.lane.b32.xlu0 %v1686_v40, %s1567_s26  ;;  %v588_v44 = vrot.slane %v587_v36, 4  ;;  %v563_v45 = vor.u32 %v562_v38, %v559_v37  ;;  %712 = vrot.lane.b32.xlu2 %v1686_v40, %s1568_s27  ;;  %v603_v46 = vshrl.u32 %v1686_v40, 16  ;;  %v548_v48 = vshll.u32 %v1675_v31, 16 }
  0x26   : > { %v547_v47 = vrot.slane %v176_v43, 4  ;;  %v568_v51 = vrot.slane %v566_v39, 5  ;;  %v554_v52 = vshll.u32 %v166_v42, 16  ;;  %v1461_v56 = vrot.slane %v1675_v31, 9 }
  0x27   : > { %1217 = vrot.lane.b32.xlu1 %v1672_v27, %s1567_s26  ;;  %v1704_v49 = vsel %vm1666_vm6, %v588_v44, %v592_v30  ;;  %v564_v50 = vrot.slane %v563_v45, 4  ;;  %v550_v55 = vrot.slane %v548_v48, 5  ;;  %v961_v57 = vrot.slane %v166_v42, 5 }
  0x28   : > { %v604_v53 = vshrl.u32 %v1704_v49, 16  ;;  %v556_v60 = vrot.slane %v554_v52, 5  ;;  %v1462_v2 = vrot.slane %v1658_v16, 9  ;;  %v965_v3 = vrot.slane %v168_v23, 5 }
  0x29   : > { %v551_v59 = vor.u32 %v550_v55, %v547_v47  ;;  %v1714_v61 = vsel %vm1666_vm6, %v564_v50, %v568_v51  ;;  %v962_v0 = vsel %vm1643_vm3, %v1461_v56, %v961_v57  ;;  %v1569_v17 = vmov 1983009808  }
  0x2a   : > { %v1710_v58 = vpack.i.b16 %v604_v53, %v603_v46  ;;  %v598_v63 = vshrl.u32 %v1714_v61, 16  ;;  %v978_v5 = vshrl.u32 %v962_v0, 16  ;;  %v966_v11 = vsel %vm1643_vm3, %v1462_v2, %v965_v3 }
  0x2b   : > { %v552_v62 = vrot.slane %v551_v59, 4  ;;  %v977_v12 = vpack.i.b16 %v966_v11, %v962_v0  ;;  %v979_v13 = vshrl.u32 %v966_v11, 16  ;;  %v187_v18 = vunpack.c.l.s4 %v1569_v17 }
  0x2c   : > { %v1570_v28 = vmov 1934713408   ;;  %vm196_vm7 = vcmask 1047556   ;;  %vm273_vm8 = vcmask 130048   ;;  %vm277_vm9 = vcmask 261120  }
  0x2d   : > { %836 = vrot.lane.b32.xlu0 %v1704_v49, %s1567_s26  ;;  %714 = vrot.lane.b32.xlu2 %v1704_v49, %s1568_s27  ;;  %v1728_v4 = vsel %vm1666_vm6, %v552_v62, %v556_v60  ;;  %v980_v15 = vpack.i.b16 %v979_v13, %v978_v5  ;;  %v1775_v23 = vunpack.c.0.s8 %v187_v18  ;;  %v201_v29 = vunpack.c.l.s4 %v1570_v28 }
  0x2e   : > { %v597_v9 = vshrl.u32 %v1728_v4, 16  ;;  %v178_v18 = vpack.i.b16 %v177_v24, %v176_v43  ;;  %vm280_vm10 = vcmask 392192   ;;  %vm283_vm11 = vcmask 523264  }
  0x2f   : > { %832 = vrot.lane.b32.xlu1 %v1714_v61, %s1567_s26  ;;  %v1022_v26 = vperm.slane %v1688_v41, %v1775_v23  ;;  %v996_v30 = vperm.slane %v983_v34, %v1775_v23  ;;  %v1017_v32 = vperm.slane %v980_v15, %v1775_v23  ;;  %v1788_v37 = vunpack.c.0.s8 %v201_v29 }
  0x30   : > { %v1735_v14 = vpack.i.b16 %v598_v63, %v597_v9  ;;  %v991_v39 = vperm.slane %v977_v12, %v1775_v23  ;;  %vm286_vm12 = vcmask 654336   ;;  %vm289_vm13 = vcmask 785408  }
  0x31   : > { %v1023_v33 = vrot.slane %v1022_v26, 4  ;;  %v997_v38 = vrot.slane %v996_v30, 4  ;;  %v1025_v62 = vrot.slane %v1017_v32, 4  ;;  %vm1345_vm14 = vcmask 1041408  }
  0x32   : > { %v999_v57 = vrot.slane %v991_v39, 4  ;;  %vm292_vm15 = vcmask 916480   ;;  %vm1348_vm0 = vcmask 1043456   ;;  %vm1351_vm1 = vcmask 1045504  }
  0x33   : > { %v1024_v41 = vsel %vm196_vm7, %v1023_v33, %v1017_v32  ;;  %v1026_v5 = vsel %vm196_vm7, %v1022_v26, %v1025_v62  ;;  %vm1369_vm2 = vcmask 293888   ;;  %vm1397_vm3 = vcmask 7168  }
  0x34   : > { %v1030_v44 = vperm.slane %v1024_v41, %v1788_v37  ;;  %v1819_v9 = vperm.slane %v1026_v5, %v1788_v37  ;;  %vm1410_vm4 = vcmask 15368  }
  0x35   : > { %830 = vrot.lane.b32.xlu0 %v1728_v4, %s1567_s26  ;;  %1093 = vrot.lane.b32.xlu2 %v1650_v10, %s1568_s27  ;;  %v998_v10 = vsel %vm196_vm7, %v997_v38, %v991_v39 }
  0x36   : > { %v1040_v45 = vunpack.c.l.b16 %v1030_v44  ;;  %v1797_v34 = vperm.slane %v998_v10, %v1788_v37  ;;  %v1035_v50 = vrot.slane %v1030_v44, 4  ;;  %v1060_v15 = vunpack.c.l.b16 %v1819_v9 }
  0x37   : > { %1211 = vrot.lane.b32.xlu1 %v962_v0, %s1567_s26 }
  0x38   : > { %v1009_v48 = vrot.slane %v1797_v34, 4  ;;  %v1036_v53 = vsel %vm196_vm7, 0, %v1035_v50 }
  0x39   : > { %v1050_v56 = vunpack.c.l.b16 %v1036_v53 }
  0x3a   : > { %v1010_v51 = vsel %vm196_vm7, 0, %v1009_v48 }
  0x3b   : > { %v1045_v52 = vunpack.c.l.b16 %v1010_v51  ;;  %v1051_v60 = vpack.c.b16 %v1050_v56, %v1050_v56 }
  0x3d   : > { %1095 = vrot.lane.b32.xlu0 %v1672_v27, %s1568_s27  ;;  %1213 = vrot.lane.b32.xlu2 %v966_v11, %s1567_s26  ;;  %v1041_v27 = vpack.c.b16 %v1040_v45, %v1040_v45  ;;  %v1046_v59 = vpack.c.b16 %v1045_v52, %v1045_v52 }
  0x3f   : > { %305 = vrot.lane.b32.xlu1 %v1641_v6, %s1568_s27 }
  0x45   : > { %303 = vrot.lane.b32.xlu0 %v1635_v1, %s1568_s27  ;;  %708 = vrot.lane.b32.xlu2 %v1728_v4, %s1568_s27 }
  0x47   : > { %1089 = vrot.lane.b32.xlu1 %v962_v0, %s1568_s27 }
  0x4d   : > { %710 = vrot.lane.b32.xlu0 %v1714_v61, %s1568_s27  ;;  %1091 = vrot.lane.b32.xlu2 %v966_v11, %s1568_s27  ;;  %v1000_v11 = vsel %vm196_vm7, %v996_v30, %v999_v57  ;;  %v1839_v30 = vperm.slane %v178_v18, %v1775_v23 }
  0x4e   : > { %v1823_v13 = vperm.slane %v1000_v11, %v1788_v37 }
  0x4f   : > { %427 = vrot.lane.b32.xlu1 %v1641_v6, %s1567_s26  ;;  %2451 = vst [vmem:[#allocation3_spill] sm:$0xff] %v1839_v30 }
  0x50   : > { %v1055_v17 = vunpack.c.l.b16 %v1823_v13 }
  0x52   : > { %v1056_v29 = vpack.c.b16 %v1055_v17, %v1055_v17 }
  0x55   : > { %425 = vrot.lane.b32.xlu0 %v1635_v1, %s1567_s26  ;;  %299 = vrot.lane.b32.xlu2 %v1675_v31, %s1568_s27 }
  0x57   : > { %421 = vrot.lane.b32.xlu1 %v1675_v31, %s1567_s26 }
  0x5d   : > { %301 = vrot.lane.b32.xlu0 %v1658_v16, %s1568_s27  ;;  %423 = vrot.lane.b32.xlu2 %v1658_v16, %s1567_s26 }
  0x5f   : > { %1047 = vrot.lane.b32.xlu1 %v1046_v59, %s1572_s29 }
  0x65   : > { %1042 = vrot.lane.b32.xlu0 %v1041_v27, %s1571_s28 }
  0x6d   : > { %1052 = vrot.lane.b32.xlu0 %v1051_v60, %s1573_s30 }
  0x75   : > { %1057 = vrot.lane.b32.xlu0 %v1056_v29, %s1575_s4 }
  0x7f   : > { %v1767_v7 = vpop.permute.xlu2 %712 }
  0x80   : > { %v725_v19 = vshrl.u32 %v1767_v7, 16 }
  0x87   : > { %v1770_v20 = vpop.permute.xlu2 %714 }
  0x88   : > { %v726_v22 = vshrl.u32 %v1770_v20, 16 }
  0x8a   : > { %v1777_v25 = vpack.i.b16 %v726_v22, %v725_v19  ;;  %v1061_v19 = vpack.c.b16 %v1060_v15, %v1060_v15  ;;  %v1833_v22 = vperm.slane %v1680_v35, %v1775_v23 }
  0x8c   : > { %2450 = vst [vmem:[#allocation2_spill] sm:$0xff] %v1833_v22  ;;  %1062 = vrot.lane.b32.xlu1 %v1061_v19, %s1574_s3  ;;  %v222_v24 = vrot.slane %v1833_v22, 4 }
  0x8e   : > { %v223_v39 = vsel %vm196_vm7, %v222_v24, %v1839_v30 }
  0x8f   : > { %v1792_v42 = vpop.permute.xlu2 %1093  ;;  %v1853_v44 = vperm.slane %v223_v39, %v1788_v37 }
  0x90   : > { %v1106_v15 = vshrl.u32 %v1792_v42, 16 }
  0x91   : > { %v1786_v36 = vpop.permute.xlu1 %1215  ;;  %v239_v10 = vunpack.c.l.b16 %v1853_v44 }
  0x93   : > { %v240_v50 = vpack.c.b16 %v239_v10, %v239_v10 }
  0x95   : > { %241 = vrot.lane.b32.xlu1 %v240_v50, %s1571_s28 }
  0x97   : > { %v1799_v46 = vpop.permute.xlu0 %834  ;;  %v1807_v55 = vpop.permute.xlu2 %1213 }
  0x98   : > { %v847_v0 = vshrl.u32 %v1799_v46, 16 }
  0x99   : > { %v1801_v47 = vpop.permute.xlu1 %1217 }
  0x9a   : > { %v1227_v35 = vpack.i.b16 %v1801_v47, %v1786_v36 }
  0x9c   : > { %v1860_v27 = vperm.slane %v1227_v35, %v1775_v23 }
  0x9f   : > { %v1809_v63 = vpop.permute.xlu0 %836  ;;  %v1836_v28 = vpop.permute.xlu2 %708 }
  0xa0   : > { %v848_v2 = vshrl.u32 %v1809_v63, 16 }
  0xa1   : > { %v1814_v3 = vpop.permute.xlu1 %832 }
  0xa2   : > { %v849_v12 = vpack.i.b16 %v848_v2, %v847_v0  ;;  %v842_v26 = vshrl.u32 %v1814_v3, 16 }
  0xa4   : > { %v885_v60 = vperm.slane %v849_v12, %v1775_v23  ;;  %v1223_v12 = vshrl.u32 %v1807_v55, 16 }
  0xa6   : > { %v886_v11 = vrot.slane %v885_v60, 4 }
  0xa7   : > { %v1841_v32 = vpop.permute.xlu0 %830  ;;  %v1092_v59 = vpop.permute.xlu2 %1091 }
  0xa8   : > { %v841_v43 = vshrl.u32 %v1841_v32, 16  ;;  %v1101_v19 = vshrl.u32 %v1092_v59, 16  ;;  %v840_v21 = vpack.i.b16 %v1814_v3, %v1841_v32 }
  0xa9   : > { %v1212_v33 = vpop.permute.xlu1 %1211 }
  0xaa   : > { %v1221_v38 = vpack.i.b16 %v1807_v55, %v1212_v33  ;;  %v843_v41 = vpack.i.b16 %v842_v26, %v841_v43  ;;  %v1222_v24 = vshrl.u32 %v1212_v33, 16 }
  0xac   : > { %v1856_v45 = vperm.slane %v1221_v38, %v1775_v23  ;;  %v880_v51 = vperm.slane %v843_v41, %v1775_v23 }
  0xae   : > { %v1243_v48 = vrot.slane %v1856_v45, 4  ;;  %v888_v0 = vrot.slane %v880_v51, 4  ;;  %v1877_v26 = vsel %vm196_vm7, %v886_v11, %v880_v51  ;;  %v1224_v51 = vpack.i.b16 %v1223_v12, %v1222_v24 }
  0xaf   : > { %v1096_v52 = vpop.permute.xlu0 %1095  ;;  %v1884_v41 = vpop.permute.xlu2 %299 }
  0xb0   : > { %v1244_v53 = vsel %vm196_vm7, %v1860_v27, %v1243_v48  ;;  %v1107_v2 = vshrl.u32 %v1096_v52, 16  ;;  %v1880_v29 = vsel %vm196_vm7, %v885_v60, %v888_v0  ;;  %v1105_v35 = vpack.i.b16 %v1096_v52, %v1792_v42 }
  0xb1   : > { %v1866_v56 = vpop.permute.xlu1 %305  ;;  %v1869_v57 = vperm.slane %v1244_v53, %v1788_v37  ;;  %v1228_v42 = vshrl.u32 %v1786_v36, 16  ;;  %v1229_v52 = vshrl.u32 %v1801_v47, 16  ;;  %v1261_v0 = vperm.slane %v1224_v51, %v1775_v23 }
  0xb2   : > { %v1108_v17 = vpack.i.b16 %v1107_v2, %v1106_v15  ;;  %v1891_v53 = vperm.slane %v1105_v35, %v1775_v23  ;;  %v317_v35 = vshrl.u32 %v1866_v56, 16 }
  0xb3   : > { %v1299_v62 = vunpack.c.l.b16 %v1869_v57  ;;  %v1230_v15 = vpack.i.b16 %v1229_v52, %v1228_v42 }
  0xb4   : > { %v1144_v10 = vperm.slane %v1108_v17, %v1775_v23  ;;  %v1269_v17 = vrot.slane %v1261_v0, 4 }
  0xb5   : > { %v1300_v5 = vpack.c.b16 %v1299_v62, %v1299_v62  ;;  %v1266_v24 = vperm.slane %v1230_v15, %v1775_v23 }
  0xb7   : > { %1301 = vrot.lane.b32.xlu2 %v1300_v5, %s1575_s4  ;;  %v304_v18 = vpop.permute.xlu0 %303  ;;  %v1270_v52 = vsel %vm196_vm7, %v1266_v24, %v1269_v17 }
  0xb9   : > { %v1090_v43 = vpop.permute.xlu1 %1089 }
  0xba   : > { %v1100_v38 = vshrl.u32 %v1090_v43, 16  ;;  %v1099_v39 = vpack.i.b16 %v1092_v59, %v1090_v43  ;;  %v1145_v59 = vrot.slane %v1144_v10, 4 }
  0xbc   : > { %v1102_v48 = vpack.i.b16 %v1101_v19, %v1100_v38  ;;  %v1888_v50 = vperm.slane %v1099_v39, %v1775_v23  ;;  %v1909_v19 = vpop.permute.xlu2 %423 }
  0xbd   : > { %v433_v39 = vshrl.u32 %v1909_v19, 16 }
  0xbe   : > { %v1121_v55 = vrot.slane %v1888_v50, 4  ;;  %v1139_v33 = vperm.slane %v1102_v48, %v1775_v23  ;;  %v316_v48 = vshrl.u32 %v304_v18, 16 }
  0xbf   : > { %v1897_v60 = vpop.permute.xlu0 %710 }
  0xc0   : > { %v1122_v62 = vsel %vm196_vm7, %v1891_v53, %v1121_v55  ;;  %v1146_v11 = vsel %vm196_vm7, %v1145_v59, %v1139_v33  ;;  %v1147_v22 = vrot.slane %v1139_v33, 4 }
  0xc1   : > { %v1902_v2 = vpop.permute.xlu1 %427  ;;  %v1905_v5 = vperm.slane %v1122_v62, %v1788_v37  ;;  %v1912_v12 = vperm.slane %v1146_v11, %v1788_v37  ;;  %v315_v62 = vpack.i.b16 %v1866_v56, %v304_v18  ;;  %v1267_v18 = vrot.slane %v1266_v24, 4 }
  0xc2   : > { %v439_v43 = vshrl.u32 %v1902_v2, 16  ;;  %v1958_v24 = vsel %vm196_vm7, %v1144_v10, %v1147_v22 }
  0xc3   : > { %v1177_v36 = vunpack.c.l.b16 %v1905_v5  ;;  %v1162_v42 = vunpack.c.l.b16 %v1912_v12  ;;  %v1940_v30 = vperm.slane %v315_v62, %v1775_v23  ;;  %v1268_v62 = vsel %vm196_vm7, %v1267_v18, %v1261_v0 }
  0xc4   : > { %v718_v18 = vpack.i.b16 %v1897_v60, %v1836_v28 }
  0xc5   : > { %v1178_v47 = vpack.c.b16 %v1177_v36, %v1177_v36  ;;  %v1929_v36 = vperm.slane %v1270_v52, %v1788_v37  ;;  %v1163_v54 = vpack.c.b16 %v1162_v42, %v1162_v42  ;;  %v1952_v42 = vperm.slane %v840_v21, %v1775_v23 }
  0xc6   : > { %v329_v52 = vrot.slane %v1940_v30, 4 }
  0xc7   : > { %1179 = vrot.lane.b32.xlu2 %v1178_v47, %s1575_s4  ;;  %v1918_v38 = vpop.permute.xlu0 %425  ;;  %v318_v47 = vpack.i.b16 %v317_v35, %v316_v48 }
  0xc8   : > { %v438_v51 = vshrl.u32 %v1918_v38, 16 }
  0xc9   : > { %v1922_v55 = vpop.permute.xlu1 %421  ;;  %v354_v48 = vperm.slane %v318_v47, %v1775_v23 }
  0xca   : > { %v432_v59 = vshrl.u32 %v1922_v55, 16  ;;  %v440_v11 = vpack.i.b16 %v439_v43, %v438_v51  ;;  %v310_v43 = vshrl.u32 %v1884_v41, 16  ;;  %v1241_v51 = vrot.slane %v1860_v27, 4 }
  0xcb   : > { %v846_v27 = vpack.i.b16 %v1809_v63, %v1799_v46  ;;  %v862_v46 = vrot.slane %v1952_v42, 4 }
  0xcc   : > { %v434_v15 = vpack.i.b16 %v433_v39, %v432_v59  ;;  %v1932_v8 = vperm.slane %v440_v11, %v1775_v23  ;;  %v1304_v39 = vunpack.c.l.b16 %v1929_v36  ;;  %v1242_v21 = vsel %vm196_vm7, %v1241_v51, %v1856_v45 }
  0xcd   : > { %v1983_v45 = vperm.slane %v1242_v21, %v1788_v37 }
  0xce   : > { %v1937_v17 = vperm.slane %v434_v15, %v1775_v23  ;;  %v477_v56 = vrot.slane %v1932_v8, 4  ;;  %v355_v15 = vrot.slane %v354_v48, 4  ;;  %v1305_v47 = vpack.c.b16 %v1304_v39, %v1304_v39 }
  0xcf   : > { %1164 = vrot.lane.b32.xlu2 %v1163_v54, %s1571_s28  ;;  %v302_v35 = vpop.permute.xlu0 %301  ;;  %v1990_v39 = vperm.slane %v846_v27, %v1775_v23  ;;  %v732_v27 = vperm.slane %v718_v18, %v1775_v23 }
  0xd0   : > { %v309_v3 = vpack.i.b16 %v302_v35, %v1884_v41  ;;  %v311_v32 = vshrl.u32 %v302_v35, 16  ;;  %v478_v33 = vsel %vm196_vm7, %v477_v56, %v1937_v17 }
  0xd1   : > { %v1955_v54 = vperm.slane %v478_v33, %v1788_v37  ;;  %v863_v21 = vsel %vm196_vm7, %v1990_v39, %v862_v46 }
  0xd2   : > { %v312_v59 = vpack.i.b16 %v311_v32, %v310_v43  ;;  %v1962_v41 = vperm.slane %v309_v3, %v1775_v23  ;;  %v1974_v43 = vperm.slane %v1268_v62, %v1788_v37  ;;  %v1119_v32 = vrot.slane %v1891_v53, 4 }
  0xd3   : > { %v494_v11 = vunpack.c.l.b16 %v1955_v54  ;;  %v1253_v62 = vrot.slane %v1983_v45, 4  ;;  %v479_v53 = vrot.slane %v1937_v17, 4  ;;  %v720_v17 = vshrl.u32 %v1897_v60, 16 }
  0xd4   : > { %v330_v22 = vsel %vm196_vm7, %v329_v52, %v1962_v41  ;;  %v349_v10 = vperm.slane %v312_v59, %v1775_v23  ;;  %v1284_v51 = vunpack.c.l.b16 %v1974_v43 }
  0xd5   : > { %v495_v56 = vpack.c.b16 %v494_v11, %v494_v11  ;;  %v1977_v0 = vperm.slane %v330_v22, %v1788_v37  ;;  %v1120_v11 = vsel %vm196_vm7, %v1119_v32, %v1888_v50  ;;  %v740_v32 = vrot.slane %v732_v27, 4 }
  0xd6   : > { %v356_v63 = vsel %vm196_vm7, %v355_v15, %v349_v10  ;;  %v357_v59 = vrot.slane %v349_v10, 4  ;;  %v1285_v10 = vpack.c.b16 %v1284_v51, %v1284_v51  ;;  %v2010_v50 = vperm.slane %v1120_v11, %v1788_v37 }
  0xd7   : > { %1306 = vrot.lane.b32.xlu2 %v1305_v47, %s1574_s3  ;;  %496 = vrot.lane.b32.xlu1 %v495_v56, %s1571_s28  ;;  %v362_v35 = vperm.slane %v356_v63, %v1788_v37  ;;  %v341_v3 = vrot.slane %v1977_v0, 4  ;;  %v2006_v63 = vperm.slane %v863_v21, %v1788_v37  ;;  %v2021_v51 = vsel %vm196_vm7, %v1932_v8, %v479_v53 }
  0xd8   : > { %v2013_v18 = vsel %vm196_vm7, %v354_v48, %v357_v59  ;;  %v719_v59 = vshrl.u32 %v1836_v28, 16  ;;  %v1131_v21 = vrot.slane %v2010_v50, 4  ;;  %v2034_v8 = vperm.slane %v1777_v25, %v1775_v23 }
  0xd9   : > { %v372_v33 = vunpack.c.l.b16 %v362_v35  ;;  %v367_v52 = vrot.slane %v362_v35, 4  ;;  %v342_v56 = vsel %vm196_vm7, 0, %v341_v3  ;;  %v1254_v35 = vsel %vm196_vm7, 0, %v1253_v62 }
  0xda   : > { %v377_v3 = vunpack.c.l.b16 %v342_v56  ;;  %v1289_v60 = vunpack.c.l.b16 %v1254_v35  ;;  %v918_v62 = vunpack.c.l.b16 %v2006_v63  ;;  %v721_v11 = vpack.i.b16 %v720_v17, %v719_v59 }
  0xdb   : > { %v373_v15 = vpack.c.b16 %v372_v33, %v372_v33  ;;  %v368_v22 = vsel %vm196_vm7, 0, %v367_v52  ;;  %v1255_v33 = vrot.slane %v1869_v57, 4  ;;  %v2452_v52 = vpack.i.b16 %v1770_v20, %v1767_v7 }
  0xdc   : > { %v382_v47 = vunpack.c.l.b16 %v368_v22  ;;  %v1290_v7 = vpack.c.b16 %v1289_v60, %v1289_v60  ;;  %v919_v20 = vpack.c.b16 %v918_v62, %v918_v62  ;;  %v1132_v28 = vsel %vm196_vm7, 0, %v1131_v21 }
  0xdd   : > { %374 = vrot.lane.b32.xlu0 %v373_v15, %s1571_s28  ;;  %v737_v48 = vperm.slane %v2452_v52, %v1775_v23  ;;  %v378_v15 = vpack.c.b16 %v377_v3, %v377_v3  ;;  %v1256_v22 = vsel %vm196_vm7, 0, %v1255_v33  ;;  %v1279_v25 = vrot.slane %v1974_v43, 4 }
  0xde   : > { %v383_v46 = vpack.c.b16 %v382_v47, %v382_v47  ;;  %v2042_v47 = vperm.slane %v721_v11, %v1775_v23  ;;  %v1309_v56 = vunpack.c.l.b16 %v1256_v22  ;;  %v1167_v35 = vunpack.c.l.b16 %v1132_v28 }
  0xdf   : > { %1286 = vrot.lane.b32.xlu1 %v1285_v10, %s1571_s28  ;;  %v741_v57 = vsel %vm196_vm7, %v737_v48, %v740_v32  ;;  %v738_v10 = vrot.slane %v737_v48, 4  ;;  %v1157_v32 = vrot.slane %v1912_v12, 4  ;;  %v1280_v59 = vsel %vm196_vm7, 0, %v1279_v25 }
  0xe0   : > { %384 = vrot.lane.b32.xlu2 %v383_v46, %s1573_s30  ;;  %v2039_v53 = vperm.slane %v741_v57, %v1788_v37  ;;  %v764_v46 = vrot.slane %v2034_v8, 4  ;;  %v1310_v33 = vpack.c.b16 %v1309_v56, %v1309_v56  ;;  %v1168_v43 = vpack.c.b16 %v1167_v35, %v1167_v35 }
  0xe1   : > { %v739_v3 = vsel %vm196_vm7, %v738_v10, %v732_v27  ;;  %v1158_v60 = vsel %vm196_vm7, 0, %v1157_v32  ;;  %v1294_v12 = vunpack.c.l.b16 %v1280_v59  ;;  %v860_v11 = vrot.slane %v1990_v39, 4 }
  0xe2   : > { %v796_v17 = vunpack.c.l.b16 %v2039_v53  ;;  %v765_v52 = vsel %vm196_vm7, %v764_v46, %v2042_v47  ;;  %v2058_v21 = vperm.slane %v739_v3, %v1788_v37  ;;  %v1172_v27 = vunpack.c.l.b16 %v1158_v60 }
  0xe3   : > { %v771_v62 = vperm.slane %v765_v52, %v1788_v37  ;;  %v1295_v22 = vpack.c.b16 %v1294_v12, %v1294_v12  ;;  %v437_v28 = vpack.i.b16 %v1902_v2, %v1918_v38  ;;  %v2074_v39 = vperm.slane %v1880_v29, %v1788_v37 }
  0xe4   : > { %v797_v48 = vpack.c.b16 %v796_v17, %v796_v17  ;;  %v750_v57 = vrot.slane %v2058_v21, 4  ;;  %v1173_v56 = vpack.c.b16 %v1172_v27, %v1172_v27  ;;  %v874_v2 = vrot.slane %v2006_v63, 4 }
  0xe5   : > { %379 = vrot.lane.b32.xlu0 %v378_v15, %s1572_s29  ;;  %v781_v15 = vunpack.c.l.b16 %v771_v62  ;;  %v2087_v38 = vperm.slane %v437_v28, %v1775_v23  ;;  %v431_v29 = vpack.i.b16 %v1909_v19, %v1922_v55  ;;  %v923_v17 = vunpack.c.l.b16 %v2074_v39 }
  0xe6   : > { %v751_v10 = vsel %vm196_vm7, 0, %v750_v57  ;;  %v776_v32 = vrot.slane %v771_v62, 4  ;;  %v2101_v63 = vperm.slane %v1735_v14, %v1775_v23  ;;  %v875_v59 = vsel %vm196_vm7, 0, %v874_v2 }
  0xe7   : > { %1291 = vrot.lane.b32.xlu1 %v1290_v7, %s1572_s29  ;;  %v893_v7 = vperm.slane %v1877_v26, %v1788_v37  ;;  %v782_v25 = vpack.c.b16 %v781_v15, %v781_v15  ;;  %v786_v35 = vunpack.c.l.b16 %v751_v10  ;;  %v451_v55 = vrot.slane %v2087_v38, 4 }
  0xe8   : > { %920 = vrot.lane.b32.xlu2 %v919_v20, %s1575_s4  ;;  %v861_v20 = vsel %vm196_vm7, %v860_v11, %v1952_v42  ;;  %v2082_v42 = vperm.slane %v1710_v58, %v1775_v23  ;;  %v2453_v58 = vpack.i.b16 %v1704_v49, %v1686_v40  ;;  %v181_v40 = vpack.i.b16 %v1641_v6, %v1635_v1 }
  0xe9   : > { %v903_v46 = vunpack.c.l.b16 %v893_v7  ;;  %v2078_v26 = vperm.slane %v861_v20, %v1788_v37  ;;  %v924_v49 = vpack.c.b16 %v923_v17, %v923_v17  ;;  %v777_v60 = vsel %vm196_vm7, 0, %v776_v32 }
  0xea   : > { %v2097_v52 = vperm.slane %v2453_v58, %v1775_v23  ;;  %v642_v19 = vrot.slane %v2082_v42, 4  ;;  %v766_v14 = vrot.slane %v2042_v47, 4  ;;  %v928_v62 = vunpack.c.l.b16 %v875_v59 }
  0xeb   : > { %v904_v3 = vpack.c.b16 %v903_v46, %v903_v46  ;;  %v2454_v11 = vpack.i.b16 %v1714_v61, %v1728_v4  ;;  %v898_v1 = vrot.slane %v893_v7, 4  ;;  %v791_v57 = vunpack.c.l.b16 %v777_v60 }
  0xec   : > { %v616_v27 = vrot.slane %v2097_v52, 4  ;;  %v643_v6 = vsel %vm196_vm7, %v642_v19, %v2101_v63  ;;  %v2131_v20 = vperm.slane %v181_v40, %v1775_v23  ;;  %v929_v61 = vpack.c.b16 %v928_v62, %v928_v62 }
  0xed   : > { %1311 = vrot.lane.b32.xlu0 %v1310_v33, %s1576_s5  ;;  %v872_v33 = vrot.slane %v2078_v26, 4  ;;  %v2121_v15 = vperm.slane %v2454_v11, %v1775_v23  ;;  %v2134_v4 = vperm.slane %v643_v6, %v1788_v37  ;;  %v767_v7 = vsel %vm196_vm7, %v2034_v8, %v766_v14 }
  0xee   : > { %v792_v10 = vpack.c.b16 %v791_v57, %v791_v57 }
  0xef   : > { %1169 = vrot.lane.b32.xlu1 %v1168_v43, %s1572_s29  ;;  %v2107_v43 = vperm.slane %v431_v29, %v1775_v23  ;;  %v873_v12 = vsel %vm196_vm7, 0, %v872_v33  ;;  %v617_v46 = vsel %vm196_vm7, %v616_v27, %v2121_v15  ;;  %v2150_v29 = vperm.slane %v767_v7, %v1788_v37  ;;  %v1043_v33 = vpop.permute.xlu0 %1042 }
  0xf0   : > { %798 = vrot.lane.b32.xlu2 %v797_v48, %s1575_s4  ;;  %v787_v48 = vpack.c.b16 %v786_v35, %v786_v35  ;;  %v908_v28 = vunpack.c.l.b16 %v873_v12  ;;  %v659_v35 = vunpack.c.l.b16 %v2134_v4  ;;  %v1076_v62 = vsel %vm273_vm8, %v1797_v34, %v1043_v33 }
  0xf1   : > { %v452_v47 = vsel %vm196_vm7, %v451_v55, %v2107_v43  ;;  %v900_v12 = vrot.slane %v2074_v39, 4 }
  0xf2   : > { %v909_v2 = vpack.c.b16 %v908_v28, %v908_v28  ;;  %v660_v59 = vpack.c.b16 %v659_v35, %v659_v35  ;;  %v2185_v28 = vperm.slane %v617_v46, %v1788_v37 }
  0xf5   : > { %1296 = vrot.lane.b32.xlu0 %v1295_v22, %s1573_s30  ;;  %v175_v22 = vpack.i.b16 %v1658_v16, %v1675_v31  ;;  %v195_v31 = vrot.slane %v2131_v20, 4 }
  0xf7   : > { %1174 = vrot.lane.b32.xlu1 %v1173_v56, %s1573_s30  ;;  %v899_v56 = vsel %vm196_vm7, 0, %v898_v1  ;;  %v2144_v16 = vperm.slane %v175_v22, %v1775_v23  ;;  %v1011_v23 = vrot.slane %v1823_v13, 4  ;;  %v2168_v13 = vperm.slane %v1958_v24, %v1788_v37  ;;  %v1048_v24 = vpop.permute.xlu1 %1047  ;;  %v1053_v1 = vpop.permute.xlu0 %1052 }
  0xf8   : > { %783 = vrot.lane.b32.xlu2 %v782_v25, %s1571_s28  ;;  %v2140_v25 = vperm.slane %v452_v47, %v1788_v37  ;;  %v913_v8 = vunpack.c.l.b16 %v899_v56  ;;  %v901_v22 = vsel %vm196_vm7, 0, %v900_v12  ;;  %v618_v12 = vrot.slane %v2121_v15, 4 }
  0xf9   : > { %v197_v32 = vsel %vm196_vm7, %v195_v31, %v2144_v16  ;;  %v1012_v55 = vsel %vm196_vm7, 0, %v1011_v23  ;;  %v1182_v11 = vunpack.c.l.b16 %v2168_v13  ;;  %v933_v56 = vunpack.c.l.b16 %v901_v22 }
  0xfa   : > { %v463_v17 = vrot.slane %v2140_v25, 4  ;;  %v914_v58 = vpack.c.b16 %v913_v8, %v913_v8  ;;  %v1065_v14 = vunpack.c.l.b16 %v1012_v55  ;;  %v1281_v31 = vrot.slane %v1929_v36, 4 }
  0xfb   : > { %v654_v22 = vrot.slane %v2134_v4, 4 }
  0xfc   : > { %v464_v19 = vsel %vm196_vm7, 0, %v463_v17  ;;  %v1066_v47 = vpack.c.b16 %v1065_v14, %v1065_v14  ;;  %v934_v17 = vpack.c.b16 %v933_v56, %v933_v56  ;;  %v1282_v33 = vsel %vm196_vm7, 0, %v1281_v31 }
  0xfd   : > { %905 = vrot.lane.b32.xlu0 %v904_v3, %s1571_s28  ;;  %v801_v3 = vunpack.c.l.b16 %v2150_v29  ;;  %v499_v60 = vunpack.c.l.b16 %v464_v19  ;;  %v1133_v14 = vrot.slane %v1905_v5, 4  ;;  %v655_v31 = vsel %vm196_vm7, 0, %v654_v22 }
  0xfe   : > { %v669_v4 = vunpack.c.l.b16 %v655_v31 }
  0xff   : > { %788 = vrot.lane.b32.xlu1 %v787_v48, %s1572_s29  ;;  %v2163_v48 = vperm.slane %v197_v32, %v1788_v37  ;;  %v802_v40 = vpack.c.b16 %v801_v3, %v801_v3  ;;  %v500_v6 = vpack.c.b16 %v499_v60, %v499_v60  ;;  %v2197_v46 = vpop.permute.xlu1 %1062  ;;  %v1058_v35 = vpop.permute.xlu0 %1057  ;;  %v752_v32 = vrot.slane %v2039_v53, 4 }
 0x100   : > { %925 = vrot.lane.b32.xlu2 %v924_v49, %s1574_s3  ;;  %v331_v49 = vrot.slane %v1962_v41, 4  ;;  %v1078_v41 = vsel %vm277_vm9, %v1076_v62, %v1048_v24  ;;  %v1134_v5 = vsel %vm196_vm7, 0, %v1133_v14 }
 0x101   : > { %v208_v27 = vrot.slane %v2163_v48, 4  ;;  %v1080_v34 = vsel %vm280_vm10, %v1078_v41, %v1053_v1  ;;  %v753_v55 = vsel %vm196_vm7, 0, %v752_v32  ;;  %v453_v1 = vrot.slane %v2107_v43, 4 }
 0x102   : > { %v332_v57 = vsel %vm196_vm7, %v1940_v30, %v331_v49  ;;  %v2202_v3 = vsel %vm283_vm11, %v1080_v34, %v1058_v35  ;;  %v234_v49 = vrot.slane %v1853_v44, 4  ;;  %v806_v60 = vunpack.c.l.b16 %v753_v55 }
 0x103   : > { %v209_v39 = vsel %vm196_vm7, 0, %v208_v27  ;;  %v2189_v7 = vperm.slane %v332_v57, %v1788_v37  ;;  %v1187_v57 = vunpack.c.l.b16 %v1134_v5  ;;  %v454_v34 = vsel %vm196_vm7, %v2087_v38, %v453_v1 }
 0x104   : > { %v235_v44 = vsel %vm196_vm7, 0, %v234_v49  ;;  %v462_v56 = vperm.slane %v454_v34, %v1788_v37  ;;  %v366_v32 = vperm.slane %v2013_v18, %v1788_v37 }
 0x105   : > { %930 = vrot.lane.b32.xlu0 %v929_v61, %s1576_s5  ;;  %v1183_v61 = vpack.c.b16 %v1182_v11, %v1182_v11  ;;  %v387_v8 = vunpack.c.l.b16 %v2189_v7  ;;  %v249_v43 = vunpack.c.l.b16 %v235_v44 }
 0x106   : > { %v509_v35 = vunpack.c.l.b16 %v462_v56  ;;  %v369_v44 = vrot.slane %v366_v32, 4 }
 0x107   : > { %793 = vrot.lane.b32.xlu1 %v792_v10, %s1573_s30  ;;  %v244_v10 = vunpack.c.l.b16 %v209_v39  ;;  %v388_v36 = vpack.c.b16 %v387_v8, %v387_v8  ;;  %v242_v62 = vpop.permute.xlu1 %241 }
 0x108   : > { %910 = vrot.lane.b32.xlu2 %v909_v2, %s1572_s29  ;;  %v628_v2 = vrot.slane %v2185_v28, 4  ;;  %v2218_v11 = vsel %vm273_vm8, %v2163_v48, %v242_v62  ;;  %v619_v48 = vsel %vm196_vm7, %v2097_v52, %v618_v12  ;;  %v1188_v52 = vpack.c.b16 %v1187_v57, %v1187_v57 }
 0x109   : > { %v245_v23 = vpack.c.b16 %v244_v10, %v244_v10  ;;  %v488_v62 = vperm.slane %v2021_v51, %v1788_v37  ;;  %v2455_v51 = vld [vmem:[#allocation3_spill] sm:$0xff] }
 0x10b   : > { %v491_v31 = vrot.slane %v488_v62, 4 }
 0x10d   : > { %915 = vrot.lane.b32.xlu0 %v914_v58, %s1573_s30  ;;  %v629_v58 = vsel %vm196_vm7, 0, %v628_v2  ;;  %v198_v2 = vrot.slane %v2144_v16, 4 }
 0x10e   : > { %v664_v19 = vunpack.c.l.b16 %v629_v58  ;;  %v510_v58 = vpack.c.b16 %v509_v35, %v509_v35 }
 0x10f   : > { %661 = vrot.lane.b32.xlu1 %v660_v59, %s1571_s28  ;;  %v1314_v59 = vunpack.c.l.b16 %v1282_v33  ;;  %v670_v33 = vpack.c.b16 %v669_v4, %v669_v4 }
 0x110   : > { %803 = vrot.lane.b32.xlu2 %v802_v40, %s1574_s3  ;;  %v489_v40 = vrot.slane %v1955_v54, 4  ;;  %v665_v24 = vpack.c.b16 %v664_v19, %v664_v19  ;;  %v807_v54 = vpack.c.b16 %v806_v60, %v806_v60  ;;  %v2259_v60 = vperm.slane %v619_v48, %v1788_v37 }
 0x111   : > { %v2192_v30 = vpop.permute.xlu2 %1301  ;;  %v1315_v27 = vpack.c.b16 %v1314_v59, %v1314_v59  ;;  %v392_v59 = vunpack.c.l.b16 %v366_v32  ;;  %v370_v48 = vsel %vm196_vm7, 0, %v369_v44 }
 0x112   : > { %v490_v41 = vsel %vm196_vm7, 0, %v489_v40 }
 0x113   : > { %v504_v15 = vunpack.c.l.b16 %v490_v41  ;;  %v393_v18 = vpack.c.b16 %v392_v59, %v392_v59  ;;  %v514_v41 = vunpack.c.l.b16 %v488_v62 }
 0x115   : > { %501 = vrot.lane.b32.xlu0 %v500_v6, %s1572_s29  ;;  %v1037_v6 = vrot.slane %v1819_v9, 4  ;;  %v505_v9 = vpack.c.b16 %v504_v15, %v504_v15 }
 0x117   : > { %1067 = vrot.lane.b32.xlu1 %v1066_v47, %s1576_s5  ;;  %v1038_v39 = vsel %vm196_vm7, 0, %v1037_v6  ;;  %v465_v6 = vrot.slane %v462_v56, 4 }
 0x118   : > { %1184 = vrot.lane.b32.xlu2 %v1183_v61, %s1574_s3  ;;  %v250_v61 = vpack.c.b16 %v249_v43, %v249_v43  ;;  %v1070_v10 = vunpack.c.l.b16 %v1038_v39  ;;  %v2456_v43 = vld [vmem:[#allocation2_spill] sm:$0xff] }
 0x119   : > { %v466_v34 = vsel %vm196_vm7, 0, %v465_v6 }
 0x11a   : > { %v1071_v8 = vpack.c.b16 %v1070_v10, %v1070_v10  ;;  %v519_v56 = vunpack.c.l.b16 %v466_v34 }
 0x11d   : > { %935 = vrot.lane.b32.xlu0 %v934_v17, %s1577_s6  ;;  %v199_v17 = vsel %vm196_vm7, %v2131_v20, %v198_v2  ;;  %v778_v20 = vrot.slane %v2150_v29, 4  ;;  %v2267_v29 = vsel %vm286_vm12, %v2202_v3, %v2197_v46  ;;  %v515_v3 = vpack.c.b16 %v514_v41, %v514_v41 }
 0x11e   : > { %v207_v16 = vperm.slane %v199_v17, %v1788_v37  ;;  %v520_v17 = vpack.c.b16 %v519_v56, %v519_v56 }
 0x11f   : > { %246 = vrot.lane.b32.xlu1 %v245_v23, %s1572_s29  ;;  %v1159_v23 = vrot.slane %v2168_v13, 4  ;;  %v779_v49 = vsel %vm196_vm7, 0, %v778_v20 }
 0x120   : > { %389 = vrot.lane.b32.xlu2 %v388_v36, %s1575_s4  ;;  %v254_v19 = vunpack.c.l.b16 %v207_v16  ;;  %v811_v12 = vunpack.c.l.b16 %v779_v49  ;;  %v210_v22 = vrot.slane %v207_v16, 4  ;;  %v630_v49 = vrot.slane %v2259_v60, 4 }
 0x121   : > { %v2210_v53 = vpop.permute.xlu2 %1179  ;;  %v1160_v36 = vsel %vm196_vm7, 0, %v1159_v23 }
 0x122   : > { %v1192_v13 = vunpack.c.l.b16 %v1160_v36  ;;  %v255_v40 = vpack.c.b16 %v254_v19, %v254_v19  ;;  %v812_v5 = vpack.c.b16 %v811_v12, %v811_v12  ;;  %v211_v4 = vsel %vm196_vm7, 0, %v210_v22 }
 0x123   : > { %v631_v41 = vsel %vm196_vm7, 0, %v630_v49 }
 0x124   : > { %v1193_v14 = vpack.c.b16 %v1192_v13, %v1192_v13 }
 0x125   : > { %1316 = vrot.lane.b32.xlu0 %v1315_v27, %s1577_s6  ;;  %v674_v27 = vunpack.c.l.b16 %v2259_v60 }
 0x127   : > { %666 = vrot.lane.b32.xlu1 %v665_v24, %s1572_s29  ;;  %v343_v24 = vrot.slane %v2189_v7, 4  ;;  %v675_v15 = vpack.c.b16 %v674_v27, %v674_v27 }
 0x128   : > { %808 = vrot.lane.b32.xlu2 %v807_v54, %s1576_s5  ;;  %v224_v54 = vrot.slane %v2455_v51, 4 }
 0x129   : > { %v2230_v47 = vpop.permute.xlu2 %1164  ;;  %v344_v46 = vsel %vm196_vm7, 0, %v343_v24 }
 0x12a   : > { %v225_v57 = vsel %vm196_vm7, %v2456_v43, %v224_v54  ;;  %v397_v7 = vunpack.c.l.b16 %v344_v46 }
 0x12c   : > { %v398_v10 = vpack.c.b16 %v397_v7, %v397_v7 }
 0x12d   : > { %506 = vrot.lane.b32.xlu0 %v505_v9, %s1573_s30  ;;  %v402_v9 = vunpack.c.l.b16 %v370_v48 }
 0x12f   : > { %1189 = vrot.lane.b32.xlu1 %v1188_v52, %s1576_s5  ;;  %v644_v52 = vrot.slane %v2101_v63, 4  ;;  %v492_v63 = vsel %vm196_vm7, 0, %v491_v31 }
 0x130   : > { %251 = vrot.lane.b32.xlu2 %v250_v61, %s1573_s30  ;;  %v233_v61 = vperm.slane %v225_v57, %v1788_v37  ;;  %v524_v19 = vunpack.c.l.b16 %v492_v63 }
 0x131   : > { %v2242_v38 = vpop.permute.xlu2 %1306  ;;  %v645_v23 = vsel %vm196_vm7, %v2082_v42, %v644_v52 }
 0x132   : > { %v259_v35 = vunpack.c.l.b16 %v233_v61  ;;  %v236_v16 = vrot.slane %v233_v61, 4  ;;  %v653_v59 = vperm.slane %v645_v23, %v1788_v37 }
 0x134   : > { %v260_v36 = vpack.c.b16 %v259_v35, %v259_v35  ;;  %v237_v13 = vsel %vm196_vm7, 0, %v236_v16  ;;  %v679_v42 = vunpack.c.l.b16 %v653_v59  ;;  %v656_v60 = vrot.slane %v653_v59, 4 }
 0x135   : > { %1072 = vrot.lane.b32.xlu0 %v1071_v8, %s1577_s6  ;;  %v403_v8 = vpack.c.b16 %v402_v9, %v402_v9  ;;  %v269_v12 = vunpack.c.l.b16 %v237_v13 }
 0x136   : > { %v680_v24 = vpack.c.b16 %v679_v42, %v679_v42  ;;  %v657_v54 = vsel %vm196_vm7, 0, %v656_v60 }
 0x137   : > { %511 = vrot.lane.b32.xlu1 %v510_v58, %s1575_s4  ;;  %v270_v44 = vpack.c.b16 %v269_v12, %v269_v12 }
 0x138   : > { %671 = vrot.lane.b32.xlu2 %v670_v33, %s1573_s30  ;;  %v264_v33 = vunpack.c.l.b16 %v211_v4 }
 0x13a   : > { %v2255_v55 = vpop.permute.xlu2 %384  ;;  %v265_v20 = vpack.c.b16 %v264_v33, %v264_v33 }
 0x13d   : > { %394 = vrot.lane.b32.xlu0 %v393_v18, %s1574_s3 }
 0x13f   : > { %1194 = vrot.lane.b32.xlu1 %v1193_v14, %s1577_s6 }
 0x140   : > { %256 = vrot.lane.b32.xlu2 %v255_v40, %s1575_s4  ;;  %v525_v40 = vpack.c.b16 %v524_v19, %v524_v19 }
 0x142   : > { %v2273_v1 = vpop.permute.xlu2 %920 }
 0x145   : > { %813 = vrot.lane.b32.xlu0 %v812_v5, %s1577_s6  ;;  %v689_v5 = vunpack.c.l.b16 %v657_v54 }
 0x147   : > { %516 = vrot.lane.b32.xlu1 %v515_v3, %s1574_s3  ;;  %v690_v46 = vpack.c.b16 %v689_v5, %v689_v5  ;;  %v1198_v3 = vsel %vm273_vm8, %v2010_v50, %v2230_v47 }
 0x148   : > { %676 = vrot.lane.b32.xlu2 %v675_v15, %s1575_s4 }
 0x149   : > { %v2284_v39 = vpop.permute.xlu1 %496 }
 0x14a   : > { %v2288_v2 = vpop.permute.xlu2 %798  ;;  %v530_v63 = vsel %vm273_vm8, %v2140_v25, %v2284_v39 }
 0x14d   : > { %399 = vrot.lane.b32.xlu0 %v398_v10, %s1576_s5 }
 0x14f   : > { %v375_v32 = vpop.permute.xlu0 %374  ;;  %404 = vrot.lane.b32.xlu1 %v403_v8, %s1577_s6 }
 0x150   : > { %521 = vrot.lane.b32.xlu2 %v520_v17, %s1576_s5  ;;  %v408_v14 = vsel %vm273_vm8, %v1977_v0, %v375_v32  ;;  %v684_v0 = vunpack.c.l.b16 %v631_v41 }
 0x151   : > { %v2297_v58 = vpop.permute.xlu1 %1286 }
 0x152   : > { %v784_v18 = vpop.permute.xlu2 %783  ;;  %v685_v43 = vpack.c.b16 %v684_v0, %v684_v0  ;;  %v1320_v59 = vsel %vm273_vm8, %v1983_v45, %v2297_v58 }
 0x153   : > { %v817_v50 = vsel %vm273_vm8, %v2058_v21, %v784_v18 }
 0x155   : > { %261 = vrot.lane.b32.xlu0 %v260_v36, %s1574_s3 }
 0x157   : > { %v380_v62 = vpop.permute.xlu0 %379  ;;  %266 = vrot.lane.b32.xlu1 %v265_v20, %s1576_s5 }
 0x158   : > { %v410_v37 = vsel %vm277_vm9, %v408_v14, %v380_v62  ;;  %526 = vrot.lane.b32.xlu2 %v525_v40, %s1577_s6 }
 0x159   : > { %v1292_v27 = vpop.permute.xlu1 %1291  ;;  %v2311_v51 = vsel %vm280_vm10, %v410_v37, %v2255_v55 }
 0x15a   : > { %v926_v15 = vpop.permute.xlu2 %925  ;;  %v1322_v19 = vsel %vm277_vm9, %v1320_v59, %v1292_v27 }
 0x15d   : > { %681 = vrot.lane.b32.xlu0 %v680_v24, %s1574_s3 }
 0x15f   : > { %v1312_v6 = vpop.permute.xlu0 %1311  ;;  %271 = vrot.lane.b32.xlu1 %v270_v44, %s1577_s6 }
 0x160   : > { %691 = vrot.lane.b32.xlu2 %v690_v46, %s1577_s6 }
 0x161   : > { %v1170_v48 = vpop.permute.xlu1 %1169 }
 0x162   : > { %v1200_v55 = vsel %vm277_vm9, %v1198_v3, %v1170_v48  ;;  %v911_v34 = vpop.permute.xlu2 %910 }
 0x165   : > { %686 = vrot.lane.b32.xlu0 %v685_v43, %s1576_s5 }
 0x167   : > { %v1297_v57 = vpop.permute.xlu0 %1296 }
 0x168   : > { %v1324_v20 = vsel %vm280_vm10, %v1322_v19, %v1297_v57 }
 0x169   : > { %v1175_v7 = vpop.permute.xlu1 %1174  ;;  %v1326_v13 = vsel %vm283_vm11, %v1324_v20, %v2192_v30 }
 0x16a   : > { %v1202_v22 = vsel %vm280_vm10, %v1200_v55, %v1175_v7  ;;  %v804_v56 = vpop.permute.xlu2 %803  ;;  %v1328_v25 = vsel %vm286_vm12, %v1326_v13, %v2242_v38 }
 0x16b   : > { %v1330_v40 = vsel %vm289_vm13, %v1328_v25, %v1312_v6  ;;  %v1204_v60 = vsel %vm283_vm11, %v1202_v22, %v2210_v53 }
 0x16f   : > { %v906_v9 = vpop.permute.xlu0 %905 }
 0x170   : > { %v939_v8 = vsel %vm273_vm8, %v2078_v26, %v906_v9 }
 0x171   : > { %v789_v61 = vpop.permute.xlu1 %788  ;;  %v941_v17 = vsel %vm277_vm9, %v939_v8, %v911_v34 }
 0x172   : > { %v819_v47 = vsel %vm277_vm9, %v817_v50, %v789_v61  ;;  %v1185_v35 = vpop.permute.xlu2 %1184 }
 0x173   : > { %v1206_v54 = vsel %vm286_vm12, %v1204_v60, %v1185_v35 }
 0x177   : > { %v931_v52 = vpop.permute.xlu0 %930 }
 0x179   : > { %v794_v10 = vpop.permute.xlu1 %793 }
 0x17a   : > { %v821_v31 = vsel %vm280_vm10, %v819_v47, %v794_v10 }
 0x17b   : > { %v823_v4 = vsel %vm283_vm11, %v821_v31, %v2288_v2  ;;  %v390_v2 = vpop.permute.xlu2 %389 }
 0x17c   : > { %v414_v8 = vsel %vm283_vm11, %v2311_v51, %v390_v2 }
 0x17f   : > { %v916_v23 = vpop.permute.xlu0 %915 }
 0x180   : > { %v943_v32 = vsel %vm280_vm10, %v941_v17, %v916_v23 }
 0x181   : > { %v945_v21 = vsel %vm283_vm11, %v943_v32, %v2273_v1  ;;  %v2335_v33 = vpop.permute.xlu1 %661 }
 0x182   : > { %v947_v38 = vsel %vm286_vm12, %v945_v21, %v926_v15  ;;  %v825_v15 = vsel %vm286_vm12, %v823_v4, %v804_v56  ;;  %v695_v19 = vsel %vm273_vm8, %v2185_v28, %v2335_v33 }
 0x183   : > { %v809_v18 = vpop.permute.xlu2 %808  ;;  %v949_v0 = vsel %vm289_vm13, %v947_v38, %v931_v52 }
 0x184   : > { %v827_v43 = vsel %vm289_vm13, %v825_v15, %v809_v18 }
 0x187   : > { %v502_v16 = vpop.permute.xlu0 %501 }
 0x188   : > { %v532_v36 = vsel %vm277_vm9, %v530_v63, %v502_v16 }
 0x189   : > { %v1068_v26 = vpop.permute.xlu1 %1067 }
 0x18a   : > { %v1086_v5 = vsel %vm289_vm13, %v2267_v29, %v1068_v26 }
 0x18b   : > { %v252_v14 = vpop.permute.xlu2 %251 }
 0x18f   : > { %v936_v1 = vpop.permute.xlu0 %935 }
 0x190   : > { %v951_v6 = vsel %vm292_vm15, %v949_v0, %v936_v1 }
 0x191   : > { %v247_v42 = vpop.permute.xlu1 %246  ;;  %v1340_v53 = vrot.slane %v951_v6, 6 }
 0x192   : > { %v279_v35 = vsel %vm277_vm9, %v2218_v11, %v247_v42 }
 0x193   : > { %v672_v12 = vpop.permute.xlu2 %671  ;;  %v282_v63 = vsel %vm280_vm10, %v279_v35, %v252_v14 }
 0x197   : > { %v1317_v39 = vpop.permute.xlu0 %1316 }
 0x198   : > { %v1332_v45 = vsel %vm292_vm15, %v1330_v40, %v1317_v39 }
 0x199   : > { %v667_v58 = vpop.permute.xlu1 %666  ;;  %v1373_v49 = vsel %vm1345_vm14, %v1332_v45, 0 }
 0x19a   : > { %1380 = vmatpush.bf16.msra.mxu0 %v1373_v49  ;;  %v697_v42 = vsel %vm277_vm9, %v695_v19, %v667_v58 }
 0x19b   : > { %v257_v41 = vpop.permute.xlu2 %256  ;;  %v699_v45 = vsel %vm280_vm10, %v697_v42, %v672_v12 }
 0x19f   : > { %v507_v62 = vpop.permute.xlu0 %506 }
 0x1a0   : > { %v534_v10 = vsel %vm280_vm10, %v532_v36, %v507_v62  ;;  %v285_v36 = vsel %vm283_vm11, %v282_v63, %v257_v41 }
 0x1a1   : > { %v1190_v30 = vpop.permute.xlu1 %1189 }
 0x1a2   : > { %v1208_v46 = vsel %vm289_vm13, %v1206_v54, %v1190_v30  ;;  %v1390_v54 = vld [vmem:[%s2443_s2 + $0x8] sm:$0xff] }
 0x1a3   : > { %v677_v9 = vpop.permute.xlu2 %676 }
 0x1a4   : > { %v701_v49 = vsel %vm283_vm11, %v699_v45, %v677_v9 }
 0x1a7   : > { %v1073_v37 = vpop.permute.xlu0 %1072 }
 0x1a8   : > { %v1088_v3 = vsel %vm292_vm15, %v1086_v5, %v1073_v37 }
 0x1a9   : > { %v512_v27 = vpop.permute.xlu1 %511  ;;  %v1342_v57 = vrot.slane %v1088_v3, 4 }
 0x1aa   : > { %v536_v4 = vsel %vm283_vm11, %v534_v10, %v512_v27  ;;  %v1473_v27 = vld [vmem:[%s2442_s1] sm:$0xff] }
 0x1ab   : > { %v522_v47 = vpop.permute.xlu2 %521 }
 0x1af   : > { %v395_v24 = vpop.permute.xlu0 %394 }
 0x1b0   : > { %v416_v32 = vsel %vm286_vm12, %v414_v8, %v395_v24 }
 0x1b1   : > { %v1195_v44 = vpop.permute.xlu1 %1194 }
 0x1b2   : > { %v1210_v48 = vsel %vm292_vm15, %v1208_v46, %v1195_v44  ;;  %v1389_v44 = vld [vmem:[%s2443_s2] sm:$0xff] }
 0x1b3   : > { %v1344_v29 = vrot.slane %v1210_v48, 2  ;;  %v527_v26 = vpop.permute.xlu2 %526 }
 0x1b7   : > { %v814_v55 = vpop.permute.xlu0 %813 }
 0x1b8   : > { %v829_v7 = vsel %vm292_vm15, %v827_v43, %v814_v55 }
 0x1b9   : > { %v1356_v34 = vsel %vm1345_vm14, %v829_v7, %v1340_v53  ;;  %v517_v22 = vpop.permute.xlu1 %516 }
 0x1ba   : > { %v1358_v61 = vsel %vm1348_vm0, %v1356_v34, %v1342_v57  ;;  %v538_v17 = vsel %vm286_vm12, %v536_v4, %v517_v22 }
 0x1bb   : > { %v1360_v56 = vsel %vm1351_vm1, %v1358_v61, %v1344_v29  ;;  %v540_v16 = vsel %vm289_vm13, %v538_v17, %v522_v47  ;;  %v692_v14 = vpop.permute.xlu2 %691 }
 0x1bc   : > { %1381 = vmatpush.bf16.msra.mxu0 %v1360_v56  ;;  %v542_v11 = vsel %vm292_vm15, %v540_v16, %v527_v26 }
 0x1bd   : > { %v1336_v18 = vrot.slane %v542_v11, 4 }
 0x1bf   : > { %v400_v52 = vpop.permute.xlu0 %399 }
 0x1c0   : > { %v418_v21 = vsel %vm289_vm13, %v416_v32, %v400_v52 }
 0x1c1   : > { %v405_v50 = vpop.permute.xlu1 %404 }
 0x1c2   : > { %v420_v59 = vsel %vm292_vm15, %v418_v21, %v405_v50 }
 0x1c3   : > { %v1334_v20 = vrot.slane %v420_v59, 6 }
 0x1c7   : > { %v262_v31 = vpop.permute.xlu0 %261 }
 0x1c8   : > { %v288_v51 = vsel %vm286_vm12, %v285_v36, %v262_v31 }
 0x1c9   : > { %v267_v23 = vpop.permute.xlu1 %266 }
 0x1ca   : > { %v291_v1 = vsel %vm289_vm13, %v288_v51, %v267_v23 }
 0x1cf   : > { %v682_v2 = vpop.permute.xlu0 %681 }
 0x1d0   : > { %v703_v28 = vsel %vm286_vm12, %v701_v49, %v682_v2 }
 0x1d1   : > { %v272_v13 = vpop.permute.xlu1 %271 }
 0x1d2   : > { %v294_v25 = vsel %vm292_vm15, %v291_v1, %v272_v13 }
 0x1d3   : > { %v1347_v39 = vsel %vm1345_vm14, %v294_v25, %v1334_v20 }
 0x1d4   : > { %v1350_v40 = vsel %vm1348_vm0, %v1347_v39, %v1336_v18 }
 0x1d7   : > { %v687_v33 = vpop.permute.xlu0 %686 }
 0x1d8   : > { %v705_v62 = vsel %vm289_vm13, %v703_v28, %v687_v33 }
 0x1d9   : > { %v707_v30 = vsel %vm292_vm15, %v705_v62, %v692_v14 }
 0x1da   : > { %v1338_v58 = vrot.slane %v707_v30, 2 }
 0x1dc   : > { %v1353_v37 = vsel %vm1351_vm1, %v1350_v40, %v1338_v58 }
 0x1dd   : > { %1382 = vmatpush.bf16.msra.mxu0 %v1353_v37 }
 0x1e0   : > { %1469 = vmatmul.msk.bf16.vlgmr.msra.gmra.mxu0 %vm1369_vm2, %v1473_v27 }
 0x25d   : > { %v1384_v12 = vpop.f32.mrf.mxu0 }
 0x25e   : > { %1391 = vadd.xlane.f32.xlu0 %v1384_v12  ;;  %v1402_v24 = vmul.f32 %v1384_v12, %v1384_v12 }
 0x260   : > { %1404 = vadd.xlane.f32.xlu2 %v1402_v24 }
 0x265   : > { %v1386_v38 = vpop.f32.mrf.mxu0 }
 0x266   : > { %v1403_v41 = vmul.f32 %v1386_v38, %v1386_v38  ;;  %1393 = vadd.xlane.f32.xlu1 %v1386_v38 }
 0x268   : > { %1406 = vadd.xlane.f32.xlu2 %v1403_v41 }
 0x2d1   : > { %v1392_v60 = vpop.xlane.xlu0 %1391 }
 0x2d2   : > { %v1395_v0 = vadd.f32 %v1392_v60, %v1389_v44 }
 0x2d3   : > { %v1405_v5 = vpop.xlane.xlu2 %1404 }
 0x2d4   : > { %1398 = vst.msk [vmem:[%s2443_s2] sm:$0xff] %vm1397_vm3, %v1395_v0 }
 0x2d9   : > { %v1394_v6 = vpop.xlane.xlu1 %1393 }
 0x2da   : > { %v1396_v46 = vadd.f32 %v1394_v6, %v1390_v54 }
 0x2db   : > { %v1400_v3 = vld [vmem:[%s2443_s2] sm:$0xff]  ;;  %v1407_v43 = vpop.xlane.xlu2 %1406 }
 0x2dc   : > { %v1408_v15 = vadd.f32 %v1405_v5, %v1400_v3  ;;  %1399 = vst.msk [vmem:[%s2443_s2 + $0x8] sm:$0xff] %vm1397_vm3, %v1396_v46 }
 0x2de   : > { %1411 = vst.msk [vmem:[%s2443_s2] sm:$0xff] %vm1410_vm4, %v1408_v15 }
 0x2e3   : > { %v1401_v48 = vld [vmem:[%s2443_s2 + $0x8] sm:$0xff] }
 0x2e4   : > { %v1409_v53 = vadd.f32 %v1407_v43, %v1401_v48 }
 0x2e6   : > { %1412 = vst.msk [vmem:[%s2443_s2 + $0x8] sm:$0xff] %vm1410_vm4, %v1409_v53 }
 0x2e7 PF: > { %s12_s13 = sadd.s32 1, %s1564_s13   ;;  %s2457_s9 = smov %s1556_s11 }
 0x2e8   : > { %p9_p9 = scmp.ge.s32.totalorder %s12_s13, 6   ;;  %s2458_s10 = smov %s1560_s12 }
 0x2e9   : > { %s2459_s11 = smov %s2462_s14  ;;  %s2460_s12 = smov %s2466_s15 }
 0x2ea   :  { %11 = sbr.rel (!%p9_p9) target bundleno = 3 (0x3), region = 58 }

</bundles_post_ra>
